<compile_context>
chip_gen: v5e
topology: v5e:2x2
jax: 0.10.0
libtpu: 0.0.40
codegen_flags: <defaults>
</compile_context>

<pallas_src>
import math

import jax
import jax.numpy as jnp
from jax.experimental import pallas as pl
from jax.experimental.pallas import tpu as pltpu

LOG_STD_MAX = 2.0
LOG_STD_MIN = -20.0
_LOG_SQRT_2PI = math.log(math.sqrt(2.0 * math.pi))
_LOG_2 = math.log(2.0)

OUT_W = 128  # lane-dense packed-output width (>= 4*A)


def _make_kernel(F, Hp, A, Tb, B):
    """Fused kernel with static row offsets into the packed (R, Hp) param buffer."""
    w1_lo = 0
    w2_lo = F
    w3_lo = F + Hp
    wh_lo = F + 2 * Hp
    b_lo = F + 3 * Hp  # b1, b2, b3, b_heads on four consecutive rows

    def kernel(x_ref, eps_ref, p_ref, out_ref):
        # Flatten Tb rollout steps into the matmul LHS: (Tb*B, F) fills the MXU rows.
        x = x_ref[...].reshape(Tb * B, F)
        eps = eps_ref[...]                       # (Tb, B, A)

        # Static slices of the single packed parameter buffer (one DMA for all params).
        w1 = p_ref[w1_lo:w1_lo + F, :]           # (F,  Hp)
        w2 = p_ref[w2_lo:w2_lo + Hp, :]          # (Hp, Hp)
        w3 = p_ref[w3_lo:w3_lo + Hp, :]          # (Hp, Hp)
        wh = p_ref[wh_lo:wh_lo + Hp, :]          # (Hp, Hp) cols [0,2A) = [wmu|wsg], rest 0
        b1 = p_ref[b_lo + 0:b_lo + 1, :]         # (1, Hp)
        b2 = p_ref[b_lo + 1:b_lo + 2, :]
        b3 = p_ref[b_lo + 2:b_lo + 3, :]
        bh = p_ref[b_lo + 3:b_lo + 4, :]         # (1, Hp) cols [0,2A) = [bmu|bsg]

        # fc1 / fc2 / fc3 -> relu (MXU, f32 accumulation). Padded lanes stay exactly 0.
        h1 = jnp.maximum(jnp.dot(x, w1, preferred_element_type=jnp.float32) + b1, 0.0)
        h2 = jnp.maximum(jnp.dot(h1, w2, preferred_element_type=jnp.float32) + b2, 0.0)
        h3 = jnp.maximum(jnp.dot(h2, w3, preferred_element_type=jnp.float32) + b3, 0.0)

        # Fused mu|sigma head: one matmul, static lane split restricted to [0, 2A).
        heads = jnp.dot(h3, wh, preferred_element_type=jnp.float32) + bh    # (Tb*B, Hp)
        mu = heads[:, 0:A].reshape(Tb, B, A)
        log_std = jnp.clip(heads[:, A:2 * A], LOG_STD_MIN, LOG_STD_MAX).reshape(Tb, B, A)
        std = jnp.exp(log_std)

        # rsample (training mode). Eval mode (gaussian_action = mu) == passing eps = 0.
        ga = mu + std * eps                      # (Tb, B, A)
        act = jnp.tanh(ga)

        # logp_pi = Normal(mu, std).log_prob(gaussian_action[0]) + tanh correction,
        # faithful to PyTorch's broadcast of batch row 0 — taken PER ROLLOUT STEP.
        ga0 = ga[:, 0:1, :]                      # (Tb, 1, A) broadcasts against (Tb, B, A)
        inv_var = jnp.exp(-2.0 * log_std)        # 1/std**2 without a divide (EUP exp)
        logp = -0.5 * (ga0 - mu) ** 2 * inv_var - log_std - _LOG_SQRT_2PI
        logp = logp - 2.0 * (_LOG_2 - ga0 - jax.nn.softplus(-2.0 * ga0))

        # Lane-dense (Tb, B, 128) output block: [mu | std | act | logp | zeros].
        # Direct slice-stores (no concatenate lane-shuffle); padding zeroed once.
        out_ref[...] = jnp.zeros_like(out_ref)
        out_ref[:, :, 0:A] = mu
        out_ref[:, :, A:2 * A] = std
        out_ref[:, :, 2 * A:3 * A] = act
        out_ref[:, :, 3 * A:4 * A] = logp

    return kernel


def pack_params(params, lane=128):
    """Pack every weight/bias into one (R, Hp) f32 buffer (one HBM->VMEM DMA).

    The hidden width H is zero-padded to Hp = multiple of 128 lanes so every
    weight tile / activation is lane-dense and (8,128)-aligned.  Row layout:
      w1 (F rows) | w2 (Hp) | w3 (Hp) | [wmu|wsg] padded (Hp)
      | b1 | b2 | b3 | [bmu|bsg] (1 row each), zero-padded to an 8-row multiple.
    """
    F, H = params["w1"].shape
    A = params["wmu"].shape[1]
    Hp = ((max(H, lane) + lane - 1) // lane) * lane
    assert 2 * A <= Hp, "fused head packing assumes 2 * n_action <= padded hidden"

    def pad_cols(w):
        return jnp.pad(w, ((0, 0), (0, Hp - w.shape[1])))

    def pad_rows(w):
        return jnp.pad(w, ((0, Hp - w.shape[0]), (0, 0)))

    w1 = pad_cols(params["w1"])                                      # (F,  Hp)
    w2 = pad_rows(pad_cols(params["w2"]))                            # (Hp, Hp)
    w3 = pad_rows(pad_cols(params["w3"]))                            # (Hp, Hp)
    wh = jnp.concatenate([params["wmu"], params["wsg"]], axis=1)     # (H, 2A)
    wh = pad_rows(pad_cols(wh))                                      # (Hp, Hp)
    b1 = pad_cols(params["b1"])
    b2 = pad_cols(params["b2"])
    b3 = pad_cols(params["b3"])
    bh = pad_cols(jnp.concatenate([params["bmu"], params["bsg"]], axis=1))

    packed = jnp.concatenate([w1, w2, w3, wh, b1, b2, b3, bh], axis=0)
    pad = (-packed.shape[0]) % 8                                     # sublane-align rows
    if pad:
        packed = jnp.pad(packed, ((0, pad), (0, 0)))
    return packed.astype(jnp.float32)


def _choose_tb(T, B, target_rows=128, prefer_multi_block=True):
    """Pick steps-per-block Tb: fill ~128 MXU rows, keep grid >= 2 when possible."""
    cap = max(1, target_rows // max(B, 1))
    divisors = [d for d in range(1, T + 1) if T % d == 0]
    candidates = [d for d in divisors if d <= cap] or [1]
    tb = max(candidates)
    if prefer_multi_block and T >= 2 and T // tb < 2:
        # Keep >= 2 grid iterations so v7x megacore (2 TCs) gets work on both cores.
        smaller = [d for d in candidates if T // d >= 2]
        if smaller:
            tb = max(smaller)
    return tb


def action_module_forward(x, packed_params, eps):
    """Fused ActionModule forward.

    x:   (B, F) or (T, B, F) float32 extract_states
    eps: (B, A) or (T, B, A) standard-normal noise (zeros -> eval mode)
    Returns (mu, action_std, action, logp_pi), each (B, A) or (T, B, A).
    """
    squeeze = x.ndim == 2
    if squeeze:
        x = x[None]
        eps = eps[None]
    T, B, F = x.shape
    A = eps.shape[-1]
    R, Hp = packed_params.shape
    assert 4 * A <= OUT_W

    Tb = _choose_tb(T, B)
    grid_t = T // Tb

    kernel = _make_kernel(F, Hp, A, Tb, B)

    flops = 2 * T * B * (F * Hp + 3 * Hp * Hp)       # 3 hidden matmuls + fused (padded) head
    transcendentals = 5 * T * B * A                  # exp, tanh, exp(-2*log_std), softplus
    bytes_accessed = 4 * (x.size + eps.size + packed_params.size + T * B * OUT_W)

    out = pl.pallas_call(
        kernel,
        out_shape=jax.ShapeDtypeStruct((T, B, OUT_W), jnp.float32),
        grid_spec=pltpu.PrefetchScalarGridSpec(
            num_scalar_prefetch=0,
            grid=(grid_t,),
            in_specs=[
                pl.BlockSpec((Tb, B, F), lambda t: (t, 0, 0)),   # Tb steps of activations
                pl.BlockSpec((Tb, B, A), lambda t: (t, 0, 0)),   # Tb steps of noise
                pl.BlockSpec((R, Hp), lambda t: (0, 0)),         # params pinned -> VMEM-resident
            ],
            out_specs=pl.BlockSpec((Tb, B, OUT_W), lambda t: (t, 0, 0)),
        ),
        compiler_params=pltpu.CompilerParams(dimension_semantics=("parallel",)),
        cost_estimate=pl.CostEstimate(flops=int(flops),
                                      transcendentals=int(transcendentals),
                                      bytes_accessed=int(bytes_accessed)),
    )(x, eps, packed_params)

    mu = out[..., 0:A]
    action_std = out[..., A:2 * A]
    action = out[..., 2 * A:3 * A]
    logp_pi = out[..., 3 * A:4 * A]
    if squeeze:
        mu, action_std, action, logp_pi = mu[0], action_std[0], action[0], logp_pi[0]
    return mu, action_std, action, logp_pi


# ----------------------------------------------------------------------------- helpers


def _init_linear(key, fan_in, fan_out):
    # PyTorch nn.Linear default: U(-1/sqrt(fan_in), 1/sqrt(fan_in)) for W and b.
    kw, kb = jax.random.split(key)
    bound = 1.0 / math.sqrt(fan_in)
    w = jax.random.uniform(kw, (fan_in, fan_out), jnp.float32, -bound, bound)
    b = jax.random.uniform(kb, (1, fan_out), jnp.float32, -bound, bound)
    return w, b


def _reference_forward(x, params, eps):
    """Pure-JAX reference matching the PyTorch module (training mode), one step."""
    hp = jax.lax.Precision.HIGHEST
    h1 = jax.nn.relu(jnp.dot(x, params["w1"], precision=hp) + params["b1"])
    h2 = jax.nn.relu(jnp.dot(h1, params["w2"], precision=hp) + params["b2"])
    h3 = jax.nn.relu(jnp.dot(h2, params["w3"], precision=hp) + params["b3"])
    mu = jnp.dot(h3, params["wmu"], precision=hp) + params["bmu"]
    sigma = jnp.dot(h3, params["wsg"], precision=hp) + params["bsg"]
    log_std = jnp.clip(sigma, LOG_STD_MIN, LOG_STD_MAX)
    std = jnp.exp(log_std)
    ga = mu + std * eps
    act = jnp.tanh(ga)
    ga0 = ga[0:1, :]
    logp = -((ga0 - mu) ** 2) / (2.0 * std * std) - log_std - _LOG_SQRT_2PI
    logp = logp - 2.0 * (_LOG_2 - ga0 - jax.nn.softplus(-2.0 * ga0))
    return mu, std, act, logp


if __name__ == "__main__":
    # n_rnn_hidden=16, n_rnn_layers=2, rnn_directions=1 -> feature_extractor F=32,
    # last_hidden H=64, n_action A=8, batch B=8.
    B, F, A = 8, 32, 8
    H = 2 * F

    root = jax.random.PRNGKey(0)
    kx, keps, kxs, kes, k1, k2, k3, kmu, ksg = jax.random.split(root, 9)

    x = jax.random.normal(kx, (B, F), jnp.float32)
    eps = jax.random.normal(keps, (B, A), jnp.float32)

    w1, b1 = _init_linear(k1, F, H)
    w2, b2 = _init_linear(k2, H, H)
    w3, b3 = _init_linear(k3, H, H)
    wmu, bmu = _init_linear(kmu, H, A)
    wsg, bsg = _init_linear(ksg, H, A)
    params = dict(w1=w1, b1=b1, w2=w2, b2=b2, w3=w3, b3=b3,
                  wmu=wmu, bmu=bmu, wsg=wsg, bsg=bsg)

    packed = pack_params(params)   # single lane-dense (R, 128) parameter slab

    # --- single step (matches the PyTorch forward signature) -----------------
    mu, action_std, action, logp_pi = jax.block_until_ready(
        action_module_forward(x, packed, eps))

    assert mu.shape == (B, A) and action_std.shape == (B, A)
    assert action.shape == (B, A) and logp_pi.shape == (B, A)

    ref = _reference_forward(x, params, eps)
    for got, want in zip((mu, action_std, action, logp_pi), ref):
        assert bool(jnp.all(jnp.isfinite(got)))
        assert bool(jnp.allclose(got, want, rtol=2e-2, atol=2e-2))

    # --- rollout over T steps: Tb steps folded per grid iteration ------------
    T = 32
    xs = jax.random.normal(kxs, (T, B, F), jnp.float32)
    epss = jax.random.normal(kes, (T, B, A), jnp.float32)
    mu_s, std_s, act_s, logp_s = jax.block_until_ready(
        action_module_forward(xs, packed, epss))
    assert mu_s.shape == (T, B, A) and logp_s.shape == (T, B, A)

    # every rollout step must match the per-step pure-JAX reference
    ref_s = jax.vmap(lambda xt, et: _reference_forward(xt, params, et))(xs, epss)
    for got, want in zip((mu_s, std_s, act_s, logp_s), ref_s):
        assert bool(jnp.all(jnp.isfinite(got)))
        assert bool(jnp.allclose(got, want, rtol=2e-2, atol=2e-2))

    # step 0 of the rollout must match a standalone single-step call
    mu0, std0, act0, logp0 = action_module_forward(xs[0], packed, epss[0])
    assert bool(jnp.allclose(mu_s[0], mu0, rtol=1e-5, atol=1e-5))
    assert bool(jnp.allclose(logp_s[0], logp0, rtol=1e-5, atol=1e-5))

    print("KERNEL_OK")
</pallas_src>

<mosaic_0001>
module attributes {stable_mosaic.version = 11 : i64} {
  func.func @kernel(%arg0: i32, %arg1: memref<1x8x32xf32, #tpu.memory_space<vmem>>, %arg2: memref<1x8x8xf32, #tpu.memory_space<vmem>>, %arg3: memref<424x128xf32, #tpu.memory_space<vmem>>, %arg4: memref<1x8x128xf32, #tpu.memory_space<vmem>>) attributes {dimension_semantics = [#tpu.dimension_semantics<parallel>], iteration_bounds = array<i64: 1>, scalar_prefetch = 0 : i64, scratch_operands = 0 : i64, tpu.core_type = #tpu.core_type<tc>, window_params = [{transform_indices = @transform_0, window_bounds = array<i64: 1, 8, 32>}, {transform_indices = @transform_1, window_bounds = array<i64: 1, 8, 8>}, {pipeline_mode = #tpu.pipeline_mode<synchronous>, transform_indices = @transform_2, window_bounds = array<i64: 424, 128>}, {transform_indices = @transform_3, window_bounds = array<i64: 1, 8, 128>}]} {
    %c0 = arith.constant 0 : index
    %c0_0 = arith.constant 0 : index
    %c0_1 = arith.constant 0 : index
    %0 = vector.load %arg1[%c0, %c0_0, %c0_1] : memref<1x8x32xf32, #tpu.memory_space<vmem>>, vector<1x8x32xf32>
    %1 = vector.shape_cast %0 : vector<1x8x32xf32> to vector<8x32xf32>
    %c0_2 = arith.constant 0 : index
    %c0_3 = arith.constant 0 : index
    %c0_4 = arith.constant 0 : index
    %2 = vector.load %arg2[%c0_2, %c0_3, %c0_4] : memref<1x8x8xf32, #tpu.memory_space<vmem>>, vector<1x8x8xf32>
    %c0_5 = arith.constant 0 : index
    %c0_6 = arith.constant 0 : index
    %3 = vector.load %arg3[%c0_5, %c0_6] : memref<424x128xf32, #tpu.memory_space<vmem>>, vector<32x128xf32>
    %c32 = arith.constant 32 : index
    %c0_7 = arith.constant 0 : index
    %4 = vector.load %arg3[%c32, %c0_7] : memref<424x128xf32, #tpu.memory_space<vmem>>, vector<128x128xf32>
    %c160 = arith.constant 160 : index
    %c0_8 = arith.constant 0 : index
    %5 = vector.load %arg3[%c160, %c0_8] : memref<424x128xf32, #tpu.memory_space<vmem>>, vector<128x128xf32>
    %c288 = arith.constant 288 : index
    %c0_9 = arith.constant 0 : index
    %6 = vector.load %arg3[%c288, %c0_9] : memref<424x128xf32, #tpu.memory_space<vmem>>, vector<128x128xf32>
    %c416 = arith.constant 416 : index
    %c0_10 = arith.constant 0 : index
    %7 = vector.load %arg3[%c416, %c0_10] : memref<424x128xf32, #tpu.memory_space<vmem>>, vector<1x128xf32>
    %c417 = arith.constant 417 : index
    %c0_11 = arith.constant 0 : index
    %8 = vector.load %arg3[%c417, %c0_11] : memref<424x128xf32, #tpu.memory_space<vmem>>, vector<1x128xf32>
    %c418 = arith.constant 418 : index
    %c0_12 = arith.constant 0 : index
    %9 = vector.load %arg3[%c418, %c0_12] : memref<424x128xf32, #tpu.memory_space<vmem>>, vector<1x128xf32>
    %c419 = arith.constant 419 : index
    %c0_13 = arith.constant 0 : index
    %10 = vector.load %arg3[%c419, %c0_13] : memref<424x128xf32, #tpu.memory_space<vmem>>, vector<1x128xf32>
    %cst = arith.constant dense<0.000000e+00> : vector<8x128xf32>
    %11 = tpu.matmul %1, %3, %cst {dimension_numbers = #tpu.dot_dimension_numbers<[1], [0], [0], [1], [0, 0, 1, 1], [], []>} : vector<8x32xf32>, vector<32x128xf32>, vector<8x128xf32> -> vector<8x128xf32>
    %12 = vector.broadcast %7 : vector<1x128xf32> to vector<8x128xf32>
    %13 = arith.addf %11, %12 : vector<8x128xf32>
    %cst_14 = arith.constant 0.000000e+00 : f32
    %14 = vector.broadcast %cst_14 : f32 to vector<8x128xf32>
    %15 = arith.maximumf %13, %14 : vector<8x128xf32>
    %cst_15 = arith.constant dense<0.000000e+00> : vector<8x128xf32>
    %16 = tpu.matmul %15, %4, %cst_15 {dimension_numbers = #tpu.dot_dimension_numbers<[1], [0], [0], [1], [0, 0, 1, 1], [], []>} : vector<8x128xf32>, vector<128x128xf32>, vector<8x128xf32> -> vector<8x128xf32>
    %17 = vector.broadcast %8 : vector<1x128xf32> to vector<8x128xf32>
    %18 = arith.addf %16, %17 : vector<8x128xf32>
    %cst_16 = arith.constant 0.000000e+00 : f32
    %19 = vector.broadcast %cst_16 : f32 to vector<8x128xf32>
    %20 = arith.maximumf %18, %19 : vector<8x128xf32>
    %cst_17 = arith.constant dense<0.000000e+00> : vector<8x128xf32>
    %21 = tpu.matmul %20, %5, %cst_17 {dimension_numbers = #tpu.dot_dimension_numbers<[1], [0], [0], [1], [0, 0, 1, 1], [], []>} : vector<8x128xf32>, vector<128x128xf32>, vector<8x128xf32> -> vector<8x128xf32>
    %22 = vector.broadcast %9 : vector<1x128xf32> to vector<8x128xf32>
    %23 = arith.addf %21, %22 : vector<8x128xf32>
    %cst_18 = arith.constant 0.000000e+00 : f32
    %24 = vector.broadcast %cst_18 : f32 to vector<8x128xf32>
    %25 = arith.maximumf %23, %24 : vector<8x128xf32>
    %cst_19 = arith.constant dense<0.000000e+00> : vector<8x128xf32>
    %26 = tpu.matmul %25, %6, %cst_19 {dimension_numbers = #tpu.dot_dimension_numbers<[1], [0], [0], [1], [0, 0, 1, 1], [], []>} : vector<8x128xf32>, vector<128x128xf32>, vector<8x128xf32> -> vector<8x128xf32>
    %27 = vector.broadcast %10 : vector<1x128xf32> to vector<8x128xf32>
    %28 = arith.addf %26, %27 : vector<8x128xf32>
    %29 = vector.extract_strided_slice %28 {offsets = [0, 0], sizes = [8, 8], strides = [1, 1]} : vector<8x128xf32> to vector<8x8xf32>
    %30 = vector.shape_cast %29 : vector<8x8xf32> to vector<1x8x8xf32>
    %31 = vector.extract_strided_slice %28 {offsets = [0, 8], sizes = [8, 8], strides = [1, 1]} : vector<8x128xf32> to vector<8x8xf32>
    %cst_20 = arith.constant -2.000000e+01 : f32
    %cst_21 = arith.constant 2.000000e+00 : f32
    %32 = vector.broadcast %cst_20 : f32 to vector<8x8xf32>
    %33 = arith.maximumf %32, %31 : vector<8x8xf32>
    %34 = vector.broadcast %cst_21 : f32 to vector<8x8xf32>
    %35 = arith.minimumf %34, %33 : vector<8x8xf32>
    %36 = vector.shape_cast %35 : vector<8x8xf32> to vector<1x8x8xf32>
    %37 = math.exp %36 : vector<1x8x8xf32>
    %38 = arith.mulf %37, %2 : vector<1x8x8xf32>
    %39 = arith.addf %30, %38 : vector<1x8x8xf32>
    %40 = math.tanh %39 : vector<1x8x8xf32>
    %41 = vector.extract_strided_slice %39 {offsets = [0, 0, 0], sizes = [1, 1, 8], strides = [1, 1, 1]} : vector<1x8x8xf32> to vector<1x1x8xf32>
    %cst_22 = arith.constant -2.000000e+00 : f32
    %42 = vector.broadcast %cst_22 : f32 to vector<1x8x8xf32>
    %43 = arith.mulf %42, %36 : vector<1x8x8xf32>
    %44 = math.exp %43 : vector<1x8x8xf32>
    %45 = vector.broadcast %41 : vector<1x1x8xf32> to vector<1x8x8xf32>
    %46 = arith.subf %45, %30 : vector<1x8x8xf32>
    %47 = arith.mulf %46, %46 : vector<1x8x8xf32>
    %cst_23 = arith.constant -5.000000e-01 : f32
    %48 = vector.broadcast %cst_23 : f32 to vector<1x8x8xf32>
    %49 = arith.mulf %48, %47 : vector<1x8x8xf32>
    %50 = arith.mulf %49, %44 : vector<1x8x8xf32>
    %51 = arith.subf %50, %36 : vector<1x8x8xf32>
    %cst_24 = arith.constant 0.918938517 : f32
    %52 = vector.broadcast %cst_24 : f32 to vector<1x8x8xf32>
    %53 = arith.subf %51, %52 : vector<1x8x8xf32>
    %cst_25 = arith.constant 0.693147182 : f32
    %54 = vector.broadcast %cst_25 : f32 to vector<1x1x8xf32>
    %55 = arith.subf %54, %41 : vector<1x1x8xf32>
    %cst_26 = arith.constant -2.000000e+00 : f32
    %56 = vector.broadcast %cst_26 : f32 to vector<1x1x8xf32>
    %57 = arith.mulf %56, %41 : vector<1x1x8xf32>
    %cst_27 = arith.constant 0.000000e+00 : f32
    %58 = vector.broadcast %cst_27 : f32 to vector<1x1x8xf32>
    %59 = arith.maximumf %57, %58 : vector<1x1x8xf32>
    %60 = vector.broadcast %cst_27 : f32 to vector<1x1x8xf32>
    %61 = arith.subf %57, %60 : vector<1x1x8xf32>
    %62 = arith.cmpf one, %61, %61 : vector<1x1x8xf32>
    %63 = vector.broadcast %cst_27 : f32 to vector<1x1x8xf32>
    %64 = arith.addf %57, %63 : vector<1x1x8xf32>
    %65 = math.absf %61 : vector<1x1x8xf32>
    %cst_28 = arith.constant 0.000000e+00 : f32
    %66 = vector.broadcast %cst_28 : f32 to vector<1x1x8xf32>
    %67 = arith.subf %66, %65 : vector<1x1x8xf32>
    %68 = math.exp %67 : vector<1x1x8xf32>
    %69 = math.log1p %68 : vector<1x1x8xf32>
    %70 = arith.addf %59, %69 : vector<1x1x8xf32>
    %71 = arith.select %62, %64, %70 : vector<1x1x8xi1>, vector<1x1x8xf32>
    %72 = arith.subf %55, %71 : vector<1x1x8xf32>
    %cst_29 = arith.constant 2.000000e+00 : f32
    %73 = vector.broadcast %cst_29 : f32 to vector<1x1x8xf32>
    %74 = arith.mulf %73, %72 : vector<1x1x8xf32>
    %75 = vector.broadcast %74 : vector<1x1x8xf32> to vector<1x8x8xf32>
    %76 = arith.subf %53, %75 : vector<1x8x8xf32>
    %cst_30 = arith.constant 0.000000e+00 : f32
    %77 = vector.broadcast %cst_30 : f32 to vector<1x8x128xf32>
    %c0_31 = arith.constant 0 : index
    %c0_32 = arith.constant 0 : index
    %c0_33 = arith.constant 0 : index
    %78 = vector.load %arg4[%c0_31, %c0_32, %c0_33] : memref<1x8x128xf32, #tpu.memory_space<vmem>>, vector<1x8x128xf32>
    tpu.vector_store %arg4[%c0_31, %c0_32, %c0_33], %77 {strides = array<i32>} : memref<1x8x128xf32, #tpu.memory_space<vmem>>, vector<1x8x128xf32>,
    %c0_34 = arith.constant 0 : index
    %c0_35 = arith.constant 0 : index
    %c0_36 = arith.constant 0 : index
    %79 = vector.load %arg4[%c0_34, %c0_35, %c0_36] : memref<1x8x128xf32, #tpu.memory_space<vmem>>, vector<1x8x8xf32>
    tpu.vector_store %arg4[%c0_34, %c0_35, %c0_36], %30 {strides = array<i32>} : memref<1x8x128xf32, #tpu.memory_space<vmem>>, vector<1x8x8xf32>,
    %c0_37 = arith.constant 0 : index
    %c0_38 = arith.constant 0 : index
    %c8 = arith.constant 8 : index
    %80 = vector.load %arg4[%c0_37, %c0_38, %c8] : memref<1x8x128xf32, #tpu.memory_space<vmem>>, vector<1x8x8xf32>
    tpu.vector_store %arg4[%c0_37, %c0_38, %c8], %37 {strides = array<i32>} : memref<1x8x128xf32, #tpu.memory_space<vmem>>, vector<1x8x8xf32>,
    %c0_39 = arith.constant 0 : index
    %c0_40 = arith.constant 0 : index
    %c16 = arith.constant 16 : index
    %81 = vector.load %arg4[%c0_39, %c0_40, %c16] : memref<1x8x128xf32, #tpu.memory_space<vmem>>, vector<1x8x8xf32>
    tpu.vector_store %arg4[%c0_39, %c0_40, %c16], %40 {strides = array<i32>} : memref<1x8x128xf32, #tpu.memory_space<vmem>>, vector<1x8x8xf32>,
    %c0_41 = arith.constant 0 : index
    %c0_42 = arith.constant 0 : index
    %c24 = arith.constant 24 : index
    %82 = vector.load %arg4[%c0_41, %c0_42, %c24] : memref<1x8x128xf32, #tpu.memory_space<vmem>>, vector<1x8x8xf32>
    tpu.vector_store %arg4[%c0_41, %c0_42, %c24], %76 {strides = array<i32>} : memref<1x8x128xf32, #tpu.memory_space<vmem>>, vector<1x8x8xf32>,
    return
  }
  func.func @transform_0(%arg0: i32) -> (i32, i32, i32) {
    %c0_i32 = arith.constant 0 : i32
    %c0_i32_0 = arith.constant 0 : i32
    %c0_i32_1 = arith.constant 0 : i32
    return %arg0, %c0_i32, %c0_i32_0 : i32, i32, i32
  }
  func.func @transform_1(%arg0: i32) -> (i32, i32, i32) {
    %c0_i32 = arith.constant 0 : i32
    %c0_i32_0 = arith.constant 0 : i32
    %c0_i32_1 = arith.constant 0 : i32
    return %arg0, %c0_i32, %c0_i32_0 : i32, i32, i32
  }
  func.func @transform_2(%arg0: i32) -> (i32, i32) {
    %c0_i32 = arith.constant 0 : i32
    %c0_i32_0 = arith.constant 0 : i32
    %c0_i32_1 = arith.constant 0 : i32
    return %c0_i32, %c0_i32_0 : i32, i32
  }
  func.func @transform_3(%arg0: i32) -> (i32, i32, i32) {
    %c0_i32 = arith.constant 0 : i32
    %c0_i32_0 = arith.constant 0 : i32
    %c0_i32_1 = arith.constant 0 : i32
    return %arg0, %c0_i32, %c0_i32_0 : i32, i32, i32
  }
}

</mosaic_0001>

<bundles_post_ra>
// kernel: tpu_custom_call.1
= control target key start
LH: loop header
LB: loop body
LE: loop exit
PB: predicated region body
PF: predicated region fallthrough
CT: control target
= control target key end

     0   :  { %8 = vsyncpa [#allocation3], 0  ;;  %s471_s0 = inlined_call_operand.hbm [shape: f32[1,8,32], index: 0, kind: input, shape index: {}]   ;;  %s472_s1 = inlined_call_operand.hbm [shape: f32[1,8,8], index: 1, kind: input, shape index: {}]   ;;  %s473_s2 = inlined_call_operand.hbm [shape: f32[424,128], index: 2, kind: input, shape index: {}]   ;;  %s474_s3 = inlined_call_operand.hbm [shape: f32[1,8,128], index: 3, kind: output, shape index: {}]  }
   0x1   :  { %9 = vsyncpa [#allocation6], 0  ;;  %s27_s14 = sshll.u32 %s472_s1, 4  ;;  %s28_s14 = int_to_ptr.hbm [resolvable:$true] %s27_s14 }
   0x2   :  { %10 = vsyncpa [#allocation4], 0  ;;  %s427_s15 = smov [#allocation5]   ;;  %s16_s19 = sshll.u32 %s471_s0, 4  ;;  %s17_s19 = int_to_ptr.hbm [resolvable:$true] %s16_s19 }
   0x3   :  { %s29_s16 = sshll.u32 %s427_s15, 4  ;;  %s428_s20 = smov [#allocation2]   ;;  %s30_s16 = int_to_ptr.vmem [resolvable:$true] %s29_s16 }
   0x4   :  { %32 = dma.hbm_to_vmem [thread:$0]  %s28_s14, 128, %s30_s16, [#allocation6]  }
   0x5   :  { %s18_s21 = sshll.u32 %s428_s20, 4  ;;  %s37_s24 = sshll.u32 %s473_s2, 4  ;;  %s19_s21 = int_to_ptr.vmem [resolvable:$true] %s18_s21  ;;  %s38_s24 = int_to_ptr.hbm [resolvable:$true] %s37_s24 }
   0x6   :  { %21 = dma.hbm_to_vmem [thread:$0]  %s17_s19, 128, %s19_s21, [#allocation3]  }
   0x7   :  { %s429_s1 = smov [#allocation7]   ;;  %s430_s26 = smov 128  }
   0x8   :  { %s39_s25 = sshll.u32 %s429_s1, 4  ;;  %s431_s27 = smov 8   ;;  %s40_s25 = int_to_ptr.vmem [resolvable:$true] %s39_s25 }
   0x9   :  { %45 = dma.hbm_to_vmem [thread:$0]  %s38_s24, 6784, %s40_s25, [#allocation6], %s430_s26, %s430_s26, %s431_s27  }
   0xa   :  { %421 = dma.done.wait [#allocation3], 128  }
   0xb   :  { %422 = vsyncadd [#allocation3], 4294967168 }
   0xc   :  { %423 = dma.done.wait [#allocation6], 6912  }
   0xd   :  { %424 = vsyncadd [#allocation6], 4294960384  ;;  %v63_v0 = vld [vmem:[#allocation7 + $0x18] sm:$0xff]  ;;  %v62_v1 = vld [vmem:[#allocation7 + $0x10] sm:$0xff]  ;;  %vm117_vm0 = vcmask 261120   ;;  %vm265_vm1 = vcmask 64512  }
   0xe   :  { %133 = vmatpush.msra.mxu0 %v63_v0  ;;  %v79_v2 = vld [vmem:[#allocation7 + $0x98] sm:$0xff]  ;;  %v61_v3 = vld [vmem:[#allocation7 + $0x8] sm:$0xff]  ;;  %v78_v4 = vld [vmem:[#allocation7 + $0x90] sm:$0xff]  ;;  %vm267_vm2 = vcmask 130112   ;;  %s433_s0 = smov 120   ;;  %s434_s2 = smov 16  }
   0xf   :  { %143 = vmatpush.msra.mxu1 %v79_v2  ;;  %v77_v5 = vld [vmem:[#allocation7 + $0x88] sm:$0xff]  ;;  %v60_v6 = vld [vmem:[#allocation7] sm:$0xff]  ;;  %v58_v7 = vld [vmem:[#allocation2] sm:$0xff]  ;;  %v432_v2 = vmov 0.0   ;;  %s435_s28 = smov 24   ;;  %vm273_vm5 = vcmask 195712  }
  0x10   :  { %134 = vmatpush.msra.mxu0 %v62_v1  ;;  %v76_v8 = vld [vmem:[#allocation7 + $0x80] sm:$0xff]  ;;  %v75_v9 = vld [vmem:[#allocation7 + $0x78] sm:$0xff]  ;;  %v74_v10 = vld [vmem:[#allocation7 + $0x70] sm:$0xff]  ;;  %264 = vst [vmem:[#allocation8] sm:$0xff] %v432_v2  ;;  %s436_s29 = smov [#allocation8]   ;;  %s288_s6 = sshll.u32 %s474_s3, 4  ;;  %s289_s6 = int_to_ptr.hbm [resolvable:$true] %s288_s6 }
  0x11   :  { %144 = vmatpush.msra.mxu1 %v78_v4  ;;  %v73_v11 = vld [vmem:[#allocation7 + $0x68] sm:$0xff]  ;;  %v72_v12 = vld [vmem:[#allocation7 + $0x60] sm:$0xff]  ;;  %v71_v13 = vld [vmem:[#allocation7 + $0x58] sm:$0xff]  ;;  %s286_s30 = sshll.u32 %s436_s29, 4  ;;  %vm279_vm6 = vcmask 261312   ;;  %s287_s30 = int_to_ptr.vmem [resolvable:$true] %s286_s30 }
  0x12   :  { %135 = vmatpush.msra.mxu0 %v61_v3  ;;  %v70_v14 = vld [vmem:[#allocation7 + $0x50] sm:$0xff]  ;;  %v69_v15 = vld [vmem:[#allocation7 + $0x48] sm:$0xff]  ;;  %v68_v16 = vld [vmem:[#allocation7 + $0x40] sm:$0xff] }
  0x13   :  { %145 = vmatpush.msra.mxu1 %v77_v5  ;;  %v67_v17 = vld [vmem:[#allocation7 + $0x38] sm:$0xff]  ;;  %v66_v18 = vld [vmem:[#allocation7 + $0x30] sm:$0xff]  ;;  %v65_v19 = vld [vmem:[#allocation7 + $0x28] sm:$0xff] }
  0x14   :  { %136 = vmatpush.msra.mxu0 %v60_v6  ;;  %v64_v20 = vld [vmem:[#allocation7 + $0x20] sm:$0xff]  ;;  %v95_v21 = vld [vmem:[#allocation7 + $0x118] sm:$0xff]  ;;  %v94_v22 = vld [vmem:[#allocation7 + $0x110] sm:$0xff] }
  0x15   :  { %299 = vmatmul.msk.f32.vlgmr.msra.gmra.mxu0 %vm117_vm0, %v58_v7  ;;  %146 = vmatpush.msra.mxu1 %v76_v8  ;;  %v93_v23 = vld [vmem:[#allocation7 + $0x108] sm:$0xff]  ;;  %v92_v24 = vld [vmem:[#allocation7 + $0x100] sm:$0xff]  ;;  %v91_v25 = vld [vmem:[#allocation7 + $0xf8] sm:$0xff] }
  0x16   :  { %165 = vmatpush.msra.mxu2 %v95_v21  ;;  %v90_v26 = vld [vmem:[#allocation7 + $0xf0] sm:$0xff]  ;;  %v89_v27 = vld [vmem:[#allocation7 + $0xe8] sm:$0xff]  ;;  %v88_v28 = vld [vmem:[#allocation7 + $0xe0] sm:$0xff] }
  0x17   :  { %147 = vmatpush.msra.mxu1 %v75_v9  ;;  %v87_v29 = vld [vmem:[#allocation7 + $0xd8] sm:$0xff]  ;;  %v86_v30 = vld [vmem:[#allocation7 + $0xd0] sm:$0xff]  ;;  %v85_v31 = vld [vmem:[#allocation7 + $0xc8] sm:$0xff] }
  0x18   :  { %166 = vmatpush.msra.mxu2 %v94_v22  ;;  %v84_v32 = vld [vmem:[#allocation7 + $0xc0] sm:$0xff]  ;;  %v83_v33 = vld [vmem:[#allocation7 + $0xb8] sm:$0xff]  ;;  %v82_v38 = vld [vmem:[#allocation7 + $0xb0] sm:$0xff] }
  0x19   :  { %148 = vmatpush.msra.mxu1 %v74_v10  ;;  %v311_v34 = vld [vmem:[#allocation7 + $0x1a0] ss:$0 sm:$0xff]  ;;  %v81_v39 = vld [vmem:[#allocation7 + $0xa8] sm:$0xff]  ;;  %v111_v41 = vld [vmem:[#allocation7 + $0x198] sm:$0xff] }
  0x1a   :  { %167 = vmatpush.msra.mxu2 %v93_v23  ;;  %v80_v40 = vld [vmem:[#allocation7 + $0xa0] sm:$0xff]  ;;  %v110_v42 = vld [vmem:[#allocation7 + $0x190] sm:$0xff]  ;;  %187 = vmatpush.msra.mxu3 %v111_v41  ;;  %v109_v43 = vld [vmem:[#allocation7 + $0x188] sm:$0xff] }
  0x1b   :  { %149 = vmatpush.msra.mxu1 %v73_v11  ;;  %v108_v44 = vld [vmem:[#allocation7 + $0x180] sm:$0xff]  ;;  %v107_v45 = vld [vmem:[#allocation7 + $0x178] sm:$0xff]  ;;  %v106_v46 = vld [vmem:[#allocation7 + $0x170] sm:$0xff] }
  0x1c   :  { %168 = vmatpush.msra.mxu2 %v92_v24  ;;  %188 = vmatpush.msra.mxu3 %v110_v42  ;;  %v105_v47 = vld [vmem:[#allocation7 + $0x168] sm:$0xff]  ;;  %v104_v48 = vld [vmem:[#allocation7 + $0x160] sm:$0xff]  ;;  %v103_v49 = vld [vmem:[#allocation7 + $0x158] sm:$0xff] }
  0x1d   :  { %150 = vmatpush.msra.mxu1 %v72_v12  ;;  %v102_v50 = vld [vmem:[#allocation7 + $0x150] sm:$0xff]  ;;  %v101_v51 = vld [vmem:[#allocation7 + $0x148] sm:$0xff]  ;;  %v100_v52 = vld [vmem:[#allocation7 + $0x140] sm:$0xff] }
  0x1e   :  { %169 = vmatpush.msra.mxu2 %v91_v25  ;;  %189 = vmatpush.msra.mxu3 %v109_v43  ;;  %v99_v53 = vld [vmem:[#allocation7 + $0x138] sm:$0xff]  ;;  %v312_v54 = vld [vmem:[#allocation7 + $0x1a1] ss:$0 sm:$0xff]  ;;  %v98_v58 = vld [vmem:[#allocation7 + $0x130] sm:$0xff] }
  0x1f   :  { %151 = vmatpush.msra.mxu1 %v71_v13  ;;  %v97_v59 = vld [vmem:[#allocation7 + $0x128] sm:$0xff]  ;;  %v96_v60 = vld [vmem:[#allocation7 + $0x120] sm:$0xff]  ;;  %v59_v61 = vld [vmem:[#allocation5] sm:$0xff] }
  0x20   :  { %170 = vmatpush.msra.mxu2 %v90_v26  ;;  %190 = vmatpush.msra.mxu3 %v108_v44  ;;  %v313_v62 = vld [vmem:[#allocation7 + $0x1a2] ss:$0 sm:$0xff]  ;;  %v314_v3 = vld [vmem:[#allocation7 + $0x1a3] ss:$0 sm:$0xff] }
  0x21   :  { %152 = vmatpush.msra.mxu1 %v70_v14  ;;  %212 = vrot.lane.b32.xlu0 %v59_v61, %s431_s27 }
  0x22   :  { %171 = vmatpush.msra.mxu2 %v89_v27  ;;  %191 = vmatpush.msra.mxu3 %v107_v45 }
  0x23   :  { %153 = vmatpush.msra.mxu1 %v69_v15 }
  0x24   :  { %172 = vmatpush.msra.mxu2 %v88_v28  ;;  %192 = vmatpush.msra.mxu3 %v106_v46 }
  0x25   :  { %154 = vmatpush.msra.mxu1 %v68_v16 }
  0x26   :  { %173 = vmatpush.msra.mxu2 %v87_v29  ;;  %193 = vmatpush.msra.mxu3 %v105_v47 }
  0x27   :  { %155 = vmatpush.msra.mxu1 %v67_v17 }
  0x28   :  { %174 = vmatpush.msra.mxu2 %v86_v30  ;;  %194 = vmatpush.msra.mxu3 %v104_v48 }
  0x29   :  { %156 = vmatpush.msra.mxu1 %v66_v18 }
  0x2a   :  { %175 = vmatpush.msra.mxu2 %v85_v31  ;;  %195 = vmatpush.msra.mxu3 %v103_v49 }
  0x2b   :  { %157 = vmatpush.msra.mxu1 %v65_v19 }
  0x2c   :  { %176 = vmatpush.msra.mxu2 %v84_v32  ;;  %196 = vmatpush.msra.mxu3 %v102_v50 }
  0x2d   :  { %158 = vmatpush.msra.mxu1 %v64_v20 }
  0x2e   :  { %177 = vmatpush.msra.mxu2 %v83_v33  ;;  %197 = vmatpush.msra.mxu3 %v101_v51 }
  0x30   :  { %178 = vmatpush.msra.mxu2 %v82_v38  ;;  %198 = vmatpush.msra.mxu3 %v100_v52 }
  0x32   :  { %179 = vmatpush.msra.mxu2 %v81_v39  ;;  %199 = vmatpush.msra.mxu3 %v99_v53 }
  0x34   :  { %180 = vmatpush.msra.mxu2 %v80_v40  ;;  %200 = vmatpush.msra.mxu3 %v98_v58 }
  0x36   :  { %201 = vmatpush.msra.mxu3 %v97_v59 }
  0x38   :  { %202 = vmatpush.msra.mxu3 %v96_v60 }
  0x92   :  { %v138_v35 = vpop.f32.mrf.mxu0 }
  0x93   :  { %v139_v36 = vadd.f32 %v311_v34, %v138_v35  ;;  %v213_v11 = vpop.permute.xlu0 %212 }
  0x95   :  { %v141_v37 = vmax.f32 %v139_v36, 0.0 }
  0x97   :  { %159 = vmatmul.f32.vlgmr.msra.gmra.mxu1 %v141_v37 }
 0x114   :  { %v160_v55 = vpop.f32.mrf.mxu1 }
 0x115   :  { %v161_v56 = vadd.f32 %v312_v54, %v160_v55 }
 0x117   :  { %v163_v57 = vmax.f32 %v161_v56, 0.0 }
 0x119   :  { %181 = vmatmul.f32.vlgmr.msra.gmra.mxu2 %v163_v57 }
 0x19c   :  { %v182_v63 = vpop.f32.mrf.mxu2 }
 0x19d   :  { %v183_v0 = vadd.f32 %v313_v62, %v182_v63 }
 0x19f   :  { %v185_v1 = vmax.f32 %v183_v0, 0.0 }
 0x1a1   :  { %203 = vmatmul.f32.vlgmr.msra.gmra.mxu3 %v185_v1 }
 0x224   :  { %v204_v4 = vpop.f32.mrf.mxu3 }
 0x225   :  { %v205_v5 = vadd.f32 %v314_v3, %v204_v4 }
 0x227   :  { %v207_v6 = vmax.f32 %v205_v5, -20.0  ;;  %266 = vst.msk [vmem:[#allocation8] sm:$0xff] %vm265_vm1, %v205_v5 }
 0x229   :  { %v208_v7 = vmin.f32 %v207_v6, 2.0 }
 0x22b   :  { %v209_v8 = vmul.f32 1.442695, %v208_v7  ;;  %v222_v9 = vmul.f32 -2.0, %v208_v7 }
 0x22d   :  { %315 = vpow2.f32 %v209_v8  ;;  %v223_v10 = vmul.f32 1.442695, %v222_v9 }
 0x22f   :  { %317 = vpow2.f32 %v223_v10 }
 0x233   :  { %v316_v12 = vpop.eup %315 }
 0x234   :  { %v215_v13 = vmul.f32 %v316_v12, %v213_v11  ;;  %268 = vst.msk [vmem:[#allocation8] sm:$0xff] %vm267_vm2, %v316_v12 }
 0x235   :  { %v318_v14 = vpop.eup %317 }
 0x236   :  { %230 = vrot.lane.b32.xlu1 %v318_v14, %s433_s0  ;;  %217 = vrot.lane.b32.xlu0 %v215_v13, %s433_s0 }
 0x23e   :  { %235 = vrot.lane.b32.xlu1 %v208_v7, %s433_s0 }
 0x2a8   :  { %v218_v15 = vpop.permute.xlu0 %217  ;;  %v231_v28 = vpop.permute.xlu1 %230 }
 0x2a9   :  { %v220_v16 = vadd.f32 %v218_v15, %v205_v5 }
 0x2ab   :  { %v241_v17 = vmul.f32 -2.0, %v220_v16  ;;  %319 = vtanh.f32 %v220_v16  ;;  %v225_v22 = vperm.slane %v220_v16, 0  ;;  %v240_v39 = vsub.f32 0.6931472, %v220_v16 }
 0x2ad   :  { %v245_v18 = vand.u32 2147483647, %v241_v17  ;;  %v226_v24 = vsub.f32 %v225_v22, %v205_v5  ;;  %v242_v35 = vmax.f32 %v241_v17, 0.0  ;;  %vm243_vm4 = vcmp.ne.f32.partialorder %v241_v17, %v241_v17 }
 0x2af   :  { %v246_v19 = vsub.f32 0.0, %v245_v18  ;;  %v227_v27 = vmul.f32 %v226_v24, %v226_v24 }
 0x2b0   :  { %v236_v40 = vpop.permute.xlu1 %235 }
 0x2b1   :  { %v320_v20 = vpop.eup %319  ;;  %v247_v21 = vmul.f32 1.442695, %v246_v19  ;;  %v228_v31 = vmul.f32 -0.5, %v227_v27 }
 0x2b2   :  { %270 = vrot.lane.b32.xlu2 %v320_v20, %s434_s2 }
 0x2b3   :  { %321 = vpow2.f32 %v247_v21  ;;  %v233_v36 = vmul.f32 %v231_v28, %v228_v31 }
 0x2b5   :  { %v238_v42 = vsub.f32 %v233_v36, %v236_v40 }
 0x2b7   :  { %v300_v45 = vadd.f32 -0.9189385, %v238_v42 }
 0x2b9   :  { %v322_v23 = vpop.eup %321 }
 0x2ba   :  { %v249_v25 = vadd.f32 1.0, %v322_v23  ;;  %v252_v26 = vmul.f32 -0.5, %v322_v23  ;;  %v255_v30 = vand.u32 2147483647, %v322_v23 }
 0x2bc   :  { %323 = vlog2.f32 %v249_v25  ;;  %v253_v29 = vadd.f32 1.0, %v252_v26  ;;  %vm256_vm3 = vcmp.lt.f32.partialorder %v255_v30, 0.0004427343 }
 0x2be   :  { %v254_v34 = vmul.f32 %v322_v23, %v253_v29 }
 0x2c2   :  { %v324_v32 = vpop.eup %323 }
 0x2c3   :  { %v251_v33 = vmul.f32 0.6931472, %v324_v32 }
 0x2c5   :  { %v257_v37 = vsel %vm256_vm3, %v254_v34, %v251_v33 }
 0x2c6   :  { %v258_v38 = vadd.f32 %v257_v37, %v242_v35 }
 0x2c8   :  { %v259_v41 = vsel %vm243_vm4, %v241_v17, %v258_v38 }
 0x2c9   :  { %v260_v43 = vsub.f32 %v240_v39, %v259_v41 }
 0x2cb   :  { %v261_v44 = vmul.f32 2.0, %v260_v43 }
 0x2cd   :  { %v262_v46 = vperm.slane %v261_v44, 0 }
 0x2cf   :  { %v263_v47 = vsub.f32 %v300_v45, %v262_v46 }
 0x2d1   :  { %276 = vrot.lane.b32.xlu2 %v263_v47, %s435_s28 }
 0x30c   :  { %v271_v48 = vpop.permute.xlu2 %270 }
 0x30d   :  { %274 = vst.msk [vmem:[#allocation8] sm:$0xff] %vm273_vm5, %v271_v48 }
 0x32b   :  { %v277_v49 = vpop.permute.xlu2 %276 }
 0x32c   :  { %280 = vst.msk [vmem:[#allocation8] sm:$0xff] %vm279_vm6, %v277_v49 }
 0x32d   :  { %291 = dma.vmem_to_hbm [thread:$0]  %s287_s30, 128, %s289_s6, [#allocation4]  }
 0x32e   :  { %425 = dma.done.wait [#allocation4], 128  }
 0x32f   :  { %426 = vsyncadd [#allocation4], 4294967168 }
 0x330   :  { %296 = vsyncpa [#allocation3], 1 }
 0x331   :  { %297 = vsyncpa [#allocation6], 1 }
 0x332   :  { %298 = vsyncpa [#allocation4], 1 }

</bundles_post_ra>
